<compile_context>
chip_gen: v7x
topology: tpu7x:2x2x1
jax: 0.10.0
libtpu: 0.0.40
codegen_flags: <defaults>
</compile_context>

<pallas_src>
import jax
import jax.numpy as jnp
from jax import lax
from jax.experimental import pallas as pl
from jax.experimental.pallas import tpu as pltpu


def _round_up(v, m):
    return ((v + m - 1) // m) * m


def _cdiv(a, b):
    return (a + b - 1) // b


def _fit_tile(dim, cap, align):
    """Largest align-multiple tile <= cap, balanced so padding waste is minimal."""
    d = _round_up(dim, align)
    if d <= cap:
        return d
    n = _cdiv(d, cap)
    return _round_up(_cdiv(dim, n), align)


def _gen_caps():
    """Generation-aware (tm, tn, tk) caps and scoped-VMEM limit."""
    try:
        vmem_cap = int(pltpu.get_tpu_info().vmem_capacity_bytes)
    except Exception:
        vmem_cap = 64 << 20  # conservative fallback (v7x-sized)
    if vmem_cap >= (96 << 20):
        # v5e / v6e class (128 MiB physical): big W/x tiles, ~48 MiB buffered.
        return (512, 2048, 2048), min(int(0.75 * vmem_cap), 100 << 20)
    # v7x class (64 MiB per TensorCore): ~28 MiB buffered, keep <=48 MiB scoped.
    return (512, 1024, 2048), min(int(0.75 * vmem_cap), 48 << 20)


# --------------------------------------------------------------------------- kernels
def _mlp_small_kernel(x_ref, wt_ref, b_ref, o_ref):
    """Whole problem in one block. x:(B,K), wt:(K,N), b:(1,N), o:(B,N)."""
    h = jnp.maximum(x_ref[...], 0.0)
    y = lax.dot_general(h, wt_ref[...],
                        dimension_numbers=(((1,), (0,)), ((), ())),
                        preferred_element_type=jnp.float32)
    o_ref[...] = (y + b_ref[...]).astype(o_ref.dtype)


def _mlp_tiled_kernel_f32(x_ref, wt_ref, b_ref, o_ref):
    """f32 output: accumulate directly into the resident output block."""
    k = pl.program_id(2)

    @pl.when(k == 0)
    def _init():
        o_ref[...] = jnp.zeros_like(o_ref)

    h = jnp.maximum(x_ref[...], 0.0)           # VPU, hidden under MXU
    o_ref[...] += lax.dot_general(h, wt_ref[...],
                                  dimension_numbers=(((1,), (0,)), ((), ())),
                                  preferred_element_type=jnp.float32)

    @pl.when(k == pl.num_programs(2) - 1)
    def _finalize():
        o_ref[...] += b_ref[...]               # bias added once, in the epilogue


def _mlp_tiled_kernel_acc(x_ref, wt_ref, b_ref, o_ref, acc_ref):
    """Low-precision output: f32 VMEM scratch accumulator, cast in epilogue."""
    k = pl.program_id(2)

    @pl.when(k == 0)
    def _init():
        acc_ref[...] = jnp.zeros_like(acc_ref)

    h = jnp.maximum(x_ref[...], 0.0)
    acc_ref[...] += lax.dot_general(h, wt_ref[...],
                                    dimension_numbers=(((1,), (0,)), ((), ())),
                                    preferred_element_type=jnp.float32)

    @pl.when(k == pl.num_programs(2) - 1)
    def _finalize():
        o_ref[...] = (acc_ref[...] + b_ref[...]).astype(o_ref.dtype)


# --------------------------------------------------------------------------- wrapper
def mlp_block(x, weight, bias, *, tile_caps=None):
    """x: (B, in), weight: (out, in) [PyTorch convention], bias: (out,)."""
    B, in_f = x.shape
    out_f, in_f2 = weight.shape
    assert in_f == in_f2
    assert bias.shape == (out_f,)
    dtype = x.dtype
    itemsize = jnp.dtype(dtype).itemsize
    sub = max(8, 32 // itemsize)               # sublane multiple (8 f32, 16 bf16)

    # ---- Fast path: tiny problems in one full-extent block (no 128-lane padding,
    # no pad copies).  Full-array block shapes are exempt from the (8,128) rule.
    work_bytes = (B * in_f + in_f * out_f + B * out_f + out_f) * 4
    if tile_caps is None and work_bytes <= (4 << 20):
        wt = weight.T                          # static param -> cache in a real model
        return pl.pallas_call(
            _mlp_small_kernel,
            out_shape=jax.ShapeDtypeStruct((B, out_f), dtype),
        )(x, wt, bias.reshape(1, out_f))

    # ---- Tiled (M, N, K) path.
    caps, vmem_cap_limit = _gen_caps()
    tm_cap, tn_cap, tk_cap = tile_caps if tile_caps is not None else caps

    tm = _fit_tile(B, tm_cap, sub)
    tn = _fit_tile(out_f, tn_cap, 128)
    tk = _fit_tile(in_f, tk_cap, 128)
    Bp = _round_up(B, tm)
    Np = _round_up(out_f, tn)
    Kp = _round_up(in_f, tk)

    # Keep >=2 parallel (i, j) tiles so both v7x TensorCores get work.
    if Bp // tm == 1 and Np // tn == 1 and Np % 256 == 0:
        tn = Np // 2

    # Weight transposed once to canonical (K, N) so the MXU RHS needs no per-tile
    # transpose; K/N padded to tile multiples.  These are static parameters --
    # in a real model prepare/cache wt/bp once outside the per-call path.
    wt = weight.T
    if Kp != in_f or Np != out_f:
        wt = jnp.pad(wt, ((0, Kp - in_f), (0, Np - out_f)))
    bp = (bias if Np == out_f else jnp.pad(bias, (0, Np - out_f))).reshape(1, Np)
    xp = x if (Bp == B and Kp == in_f) else jnp.pad(x, ((0, Bp - B), (0, Kp - in_f)))

    grid = (Bp // tm, Np // tn, Kp // tk)

    use_scratch = dtype != jnp.float32
    kernel = _mlp_tiled_kernel_acc if use_scratch else _mlp_tiled_kernel_f32
    scratch = (pltpu.VMEM((tm, tn), jnp.float32),) if use_scratch else ()

    # Scoped-VMEM budget: double-buffered x/W/bias/out tiles (+ f32 acc), 2x
    # headroom, clamped to the generation-safe cap (never the full physical VMEM).
    io_bytes = 2 * (tm * tk + tk * tn + tn + tm * tn) * itemsize
    acc_bytes = tm * tn * 4 if use_scratch else 0
    vmem_limit = int(min(vmem_cap_limit, max(32 << 20, 2 * (io_bytes + acc_bytes))))

    out_p = pl.pallas_call(
        kernel,
        out_shape=jax.ShapeDtypeStruct((Bp, Np), dtype),
        grid=grid,
        in_specs=[
            pl.BlockSpec((tm, tk), lambda i, j, k: (i, k)),   # x tile
            pl.BlockSpec((tk, tn), lambda i, j, k: (k, j)),   # W.T tile (K, N)
            pl.BlockSpec((1, tn), lambda i, j, k: (0, j)),    # bias tile
        ],
        out_specs=pl.BlockSpec((tm, tn), lambda i, j, k: (i, j)),
        scratch_shapes=scratch,
        compiler_params=pltpu.CompilerParams(
            dimension_semantics=("parallel", "parallel", "arbitrary"),
            vmem_limit_bytes=vmem_limit,
        ),
    )(xp, wt, bp)

    if Bp == B and Np == out_f:
        return out_p
    return out_p[:B, :out_f]


def reference(x, weight, bias):
    return jnp.maximum(x, 0.0) @ weight.T + bias


# --------------------------------------------------------------------------- test
if __name__ == "__main__":
    key = jax.random.PRNGKey(0)

    def run_case(batch, input_size, output_size, case_key, tile_caps=None, tol=1e-4):
        k_x, k_w, k_b = jax.random.split(case_key, 3)

        # Round test data to bf16-representable f32 values: MXU products are then
        # exact regardless of the compiler's f32 pass count, so kernel vs. XLA
        # reference differ only by f32 summation order (<< tol).
        def bf16ify(v):
            return v.astype(jnp.bfloat16).astype(jnp.float32)

        bound = float(input_size) ** -0.5       # mirrors nn.Linear init scale
        x = bf16ify(jax.random.normal(k_x, (batch, input_size), dtype=jnp.float32))
        weight = bf16ify(jax.random.uniform(k_w, (output_size, input_size),
                                            minval=-bound, maxval=bound,
                                            dtype=jnp.float32))
        bias = bf16ify(jax.random.uniform(k_b, (output_size,),
                                          minval=-bound, maxval=bound,
                                          dtype=jnp.float32))

        out = jax.block_until_ready(mlp_block(x, weight, bias, tile_caps=tile_caps))
        ref = reference(x, weight, bias)
        assert out.shape == (batch, output_size)
        assert jnp.allclose(out, ref, atol=tol, rtol=tol), (
            f"max abs err {jnp.max(jnp.abs(out - ref))}")

    keys = jax.random.split(key, 4)
    # Small shapes implied by the module -> single-block fast path (no lane padding).
    run_case(8, 32, 16, keys[0])
    run_case(9, 40, 24, keys[1])
    # Larger shapes -> tiled (M, N, K) path; exercises the >=2-N-tile split.
    run_case(384, 768, 768, keys[2])
    # Ragged shapes + forced small tile caps -> padding on M/N/K and a real
    # multi-step K accumulation through the pipeline.
    run_case(41, 500, 380, keys[3], tile_caps=(32, 128, 128))

    print("KERNEL_OK")
</pallas_src>

<mosaic_0001>
module attributes {stable_mosaic.version = 11 : i64} {
  func.func @_mlp_small_kernel(%arg0: memref<8x32xf32, #tpu.memory_space<vmem>>, %arg1: memref<32x16xf32, #tpu.memory_space<vmem>>, %arg2: memref<1x16xf32, #tpu.memory_space<vmem>>, %arg3: memref<8x16xf32, #tpu.memory_space<vmem>>) attributes {dimension_semantics = [], scalar_prefetch = 0 : i64, scratch_operands = 0 : i64, tpu.core_type = #tpu.core_type<tc>} {
    %c0 = arith.constant 0 : index
    %c0_0 = arith.constant 0 : index
    %0 = vector.load %arg0[%c0, %c0_0] : memref<8x32xf32, #tpu.memory_space<vmem>>, vector<8x32xf32>
    %cst = arith.constant 0.000000e+00 : f32
    %1 = vector.broadcast %cst : f32 to vector<8x32xf32>
    %2 = arith.maximumf %0, %1 : vector<8x32xf32>
    %c0_1 = arith.constant 0 : index
    %c0_2 = arith.constant 0 : index
    %3 = vector.load %arg1[%c0_1, %c0_2] : memref<32x16xf32, #tpu.memory_space<vmem>>, vector<32x16xf32>
    %cst_3 = arith.constant dense<0.000000e+00> : vector<8x16xf32>
    %4 = tpu.matmul %2, %3, %cst_3 {dimension_numbers = #tpu.dot_dimension_numbers<[1], [0], [0], [1], [0, 0, 1, 1], [], []>} : vector<8x32xf32>, vector<32x16xf32>, vector<8x16xf32> -> vector<8x16xf32>
    %c0_4 = arith.constant 0 : index
    %c0_5 = arith.constant 0 : index
    %5 = vector.load %arg2[%c0_4, %c0_5] : memref<1x16xf32, #tpu.memory_space<vmem>>, vector<1x16xf32>
    %6 = vector.broadcast %5 : vector<1x16xf32> to vector<8x16xf32>
    %7 = arith.addf %4, %6 : vector<8x16xf32>
    %c0_6 = arith.constant 0 : index
    %c0_7 = arith.constant 0 : index
    %8 = vector.load %arg3[%c0_6, %c0_7] : memref<8x16xf32, #tpu.memory_space<vmem>>, vector<8x16xf32>
    tpu.vector_store %arg3[%c0_6, %c0_7], %7 {strides = array<i32>} : memref<8x16xf32, #tpu.memory_space<vmem>>, vector<8x16xf32>,
    return
  }
}

</mosaic_0001>

<bundles_post_ra>
// kernel: tpu_custom_call.1
= control target key start
LH: loop header
LB: loop body
LE: loop exit
PB: predicated region body
PF: predicated region fallthrough
CT: control target
= control target key end

     0   :  { %v170_v3 = vmov 0.0|0.0   ;;  %vm171_vm0 = vmmov 0   ;;  %v172_v6 = vmov 0.0   ;;  %s224_s0 = inlined_call_operand.vmem [shape: f32[8,32], index: 0, kind: input, shape index: {}]   ;;  %s225_s1 = inlined_call_operand.vmem [shape: f32[32,16], index: 1, kind: input, shape index: {}]   ;;  %s226_s2 = inlined_call_operand.vmem [shape: f32[1,16], index: 2, kind: input, shape index: {}]   ;;  %s227_s3 = inlined_call_operand.hbm [shape: f32[8,16], index: 3, kind: output, shape index: {}]  }
   0x1   :  { %v17_v0 = vld [vmem:[%s225_s1] sm:$0xff]  ;;  %v18_v1 = vld [vmem:[%s225_s1 + $0x8] sm:$0xff]  ;;  %v19_v2 = vld [vmem:[%s225_s1 + $0x10] sm:$0xff]  ;;  %136 = vmatprep.subr.bf16.mxu0 %v170_v3  ;;  %133 = vmatprep.mubr.msk.f32.mxu0 %vm171_vm0, %v172_v6 }
   0x2   :  { %v137_v4 = vpack.c.bf16 %v18_v1, %v17_v0  ;;  %v20_v5 = vld [vmem:[%s225_s1 + $0x18] sm:$0xff] }
   0x3   :  { %8 = vsyncpa [#allocation3], 0  ;;  %v140_v7 = vpack.c.bf16 %v20_v5, %v19_v2  ;;  %v15_v8 = vld [vmem:[%s224_s0] sm:$0xff]  ;;  %vm28_vm1 = vcmask 261120   ;;  %s173_s1 = smov [#allocation2]   ;;  %vm102_vm2 = vcmask 130048  }
   0x4   :  { %138 = vmatpush3.bf16.msra.mxu0 %v137_v4  ;;  %v16_v9 = vmax.f32 %v15_v8, 0.0  ;;  %v118_v10 = vld [vmem:[%s226_s2] ss:$0 sm:$0xff]  ;;  %s110_s24 = sshll.u32 %s173_s1, 4  ;;  %s111_s24 = int_to_ptr.vmem [resolvable:$true] %s110_s24 }
   0x5   :  { %139 = vmatprep.subr.bf16.mxu0 %v170_v3  ;;  %s146_s25 = scalar_lea.vmem %s111_s24, 128  ;;  %p151_p1 = scmp.lt.s32.totalorder %s111_s24, %s111_s24 }
   0x6   :  { %p147_p0 = scmp.ne.s32.totalorder %s111_s24, %s146_s25  ;;  %p152_p2 = scmp.lt.s32.totalorder %s146_s25, %s146_s25 }
   0x8   :  { %141 = vmatpush3.bf16.msra.mxu0 %v140_v7  ;;  %p153_p3 = por %p152_p2, %p151_p1 }
   0xa   :  { %p154_p4 = pnand %p153_p3, %p147_p0 }
   0xb   :  { %134 = vmatmul.mubr.msk.f32.vlgmr.msra.gmra.mrb[0].mxu0 %vm28_vm1, %v16_v9 }
  0xde   :  { %v98_v11 = vpop.f32.mrb[0].mxu0 }
  0xdf   :  { %v99_v12 = vadd.f32 %v118_v10, %v98_v11  ;;  %v135_v13 = vpop.f32.mrb[1].mxu0 }
  0xe1   :  { %103 = vst.msk [vmem:[#allocation2] sm:$0xff] %vm102_vm2, %v99_v12 }
  0xe2   :  { %157 = shalt.err (!%p154_p4)
}
  0xe3   :  { %s158_s27 = scalar_lea.hbm %s227_s3, 128 }
  0xe4   :  { %p159_p5 = scmp.ne.s32.totalorder %s227_s3, %s158_s27  ;;  %p162_p6 = scmp.lt.u32.totalorder %s158_s27, %s227_s3 }
  0xe6   :  { %p164_p7 = pnand %p162_p6, %p159_p5 }
  0xe8   :  { %167 = shalt.err (!%p164_p7)
}
  0xe9   :  { %113 = dma.vmem_to_hbm [thread:$0]  %s111_s24, 128, %s227_s3, [#allocation3]  }
  0xea   :  { %168 = dma.done.wait [#allocation3], 128  }
  0xeb   :  { %169 = vsyncadd [#allocation3], 4294967168 }
  0xec   :  { %117 = vsyncpa [#allocation3], 1 }

</bundles_post_ra>
